<compile_context>
chip_gen: v7x
topology: tpu7x:2x2x1
jax: 0.10.0
libtpu: 0.0.40
codegen_flags: <defaults>
</compile_context>

<pallas_src>
import jax
import jax.numpy as jnp
from jax.experimental import pallas as pl
from jax.experimental.pallas import tpu as pltpu


def _round_up(x, m):
    return ((x + m - 1) // m) * m


def _conv_gemm_kernel(w_ref, p_ref, o_ref):
    """One M-tile of the transposed im2col GEMM.

    w_ref : (Cout_p, K_p)  full (padded) weight matrix, resident across the grid
    p_ref : (K_p, tm)      patch columns for this M tile (lane-dense along M)
    o_ref : (Cout_p, tm)   output tile (lane-dense along M, Cout on sublanes)
    """
    o_ref[...] = jnp.dot(
        w_ref[...], p_ref[...], preferred_element_type=jnp.float32
    ).astype(o_ref.dtype)


def conv2d_strided(x_nchw, w_oihw, stride=(3, 3), padding=(2, 2)):
    """2D convolution, stride (3,3), padding (2,2), dilation 1, groups 1, no bias."""
    N, Cin, H, W = x_nchw.shape
    Cout, Cin_w, KH, KW = w_oihw.shape
    assert Cin == Cin_w
    SH, SW = stride
    PH, PW = padding
    Hout = (H + 2 * PH - KH) // SH + 1
    Wout = (W + 2 * PW - KW) // SW + 1
    M = N * Hout * Wout
    K = Cin * KH * KW

    # --- glue: zero-pad + im2col, directly in (K, M) orientation ------------
    xp = jnp.pad(x_nchw, ((0, 0), (0, 0), (PH, PH), (PW, PW)))         # (N,Cin,Hp,Wp)

    if (SH, SW) == (KH, KW):
        # Non-overlapping windows (this module): pure crop + reshape + transpose.
        xc = xp[:, :, :Hout * SH, :Wout * SW]                          # (N,Cin,Ho*KH,Wo*KW)
        pt = xc.reshape(N, Cin, Hout, KH, Wout, KW)
        pt = jnp.transpose(pt, (1, 3, 5, 0, 2, 4))                     # (Cin,KH,KW,N,Ho,Wo)
    else:
        # General strided fallback (correct; duplicates input ~KH*KW in HBM).
        # Perf-only follow-up: do windowed reads in-kernel for overlapping strides.
        slabs = []
        for kh in range(KH):
            for kw in range(KW):
                slabs.append(
                    xp[:, :, kh:kh + SH * (Hout - 1) + 1:SH,
                             kw:kw + SW * (Wout - 1) + 1:SW]           # (N,Cin,Ho,Wo)
                )
        pt = jnp.stack(slabs, axis=0)                                  # (KK,N,Cin,Ho,Wo)
        pt = jnp.transpose(pt, (2, 0, 1, 3, 4))                        # (Cin,KK,N,Ho,Wo)

    patchesT = pt.reshape(K, M)                                        # K ordered (cin,kh,kw)
    wmatT = w_oihw.reshape(Cout, K)                                    # same K order, no transpose

    # --- padding / tiling ----------------------------------------------------
    LANE, SUB = 128, 8
    Cout_p = _round_up(Cout, SUB)           # sublane granule only (no 128 pad)
    K_p = _round_up(K, SUB)
    M_lane = _round_up(M, LANE)             # M is the lane axis now

    # VMEM-aware M-tile cap: double-buffered (patch col + out col) streams stay
    # well under the scoped budget, leaving headroom for the resident weight.
    bytes_per_col = 4 * (K_p + Cout_p)
    vmem_budget = 32 * 1024 * 1024
    tm_cap = max(LANE, ((vmem_budget // (2 * bytes_per_col)) // LANE) * LANE)
    tm = min(2048, tm_cap, M_lane)

    grid_m = pl.cdiv(M_lane, tm)
    if grid_m < 2 and M_lane >= 2 * LANE:
        grid_m = 2                          # v7x: give both TensorCores work
    tm = _round_up(pl.cdiv(M_lane, grid_m), LANE)
    M_p = tm * grid_m

    patchesT_p = jnp.pad(patchesT, ((0, K_p - K), (0, M_p - M)))
    wmatT_p = jnp.pad(wmatT, ((0, Cout_p - Cout), (0, K_p - K)))

    cost = pl.CostEstimate(
        flops=2 * M * K * Cout,
        transcendentals=0,
        bytes_accessed=4 * (M * K + K * Cout + M * Cout),
    )

    # --- Pallas kernel: single GEMM, tiled over M (lanes) only ---------------
    out = pl.pallas_call(
        _conv_gemm_kernel,
        out_shape=jax.ShapeDtypeStruct((Cout_p, M_p), x_nchw.dtype),
        grid_spec=pltpu.PrefetchScalarGridSpec(
            num_scalar_prefetch=0,
            grid=(grid_m,),
            in_specs=[
                pl.BlockSpec((Cout_p, K_p), lambda i: (0, 0)),   # full weight, resident
                pl.BlockSpec((K_p, tm), lambda i: (0, i)),       # patch M-tile (lane-dense)
            ],
            out_specs=pl.BlockSpec((Cout_p, tm), lambda i: (0, i)),
        ),
        compiler_params=pltpu.CompilerParams(
            dimension_semantics=("parallel",),
            vmem_limit_bytes=48 * 1024 * 1024,
            allow_input_fusion=[True, True],
        ),
        cost_estimate=cost,
    )(wmatT_p, patchesT_p)

    # --- glue: strip padding, back to NCHW -----------------------------------
    out = out[:Cout, :M].reshape(Cout, N, Hout, Wout)
    return jnp.transpose(out, (1, 0, 2, 3))                            # (N,Cout,Hout,Wout)


if __name__ == "__main__":
    key = jax.random.PRNGKey(0)
    k_x, k_w = jax.random.split(key)

    # Small shapes consistent with the module's dynamic [-1,-1,-1,-1] f32 inputs.
    N, Cin, H, W = 2, 4, 16, 16
    Cout, KH, KW = 8, 3, 3

    x = jax.random.normal(k_x, (N, Cin, H, W), dtype=jnp.float32)
    w = jax.random.normal(k_w, (Cout, Cin, KH, KW), dtype=jnp.float32)

    conv = jax.jit(lambda a, b: conv2d_strided(a, b))
    out = jax.block_until_ready(conv(x, w))

    # Reference: XLA convolution with identical semantics.
    ref = jax.lax.conv_general_dilated(
        x, w,
        window_strides=(3, 3),
        padding=((2, 2), (2, 2)),
        lhs_dilation=(1, 1),
        rhs_dilation=(1, 1),
        dimension_numbers=("NCHW", "OIHW", "NCHW"),
        feature_group_count=1,
    )
    assert out.shape == ref.shape, (out.shape, ref.shape)
    assert jnp.allclose(out, ref, atol=1e-4, rtol=1e-4), "mismatch vs reference conv"

    print("KERNEL_OK")
</pallas_src>

<mosaic_0001>
module attributes {stable_mosaic.version = 11 : i64} {
  func.func @_conv_gemm_kernel(%arg0: i32, %arg1: memref<8x40xf32, #tpu.memory_space<vmem>>, %arg2: memref<40x128xf32, #tpu.memory_space<vmem>>, %arg3: memref<8x128xf32, #tpu.memory_space<vmem>>) attributes {dimension_semantics = [#tpu.dimension_semantics<parallel>], iteration_bounds = array<i64: 1>, scalar_prefetch = 0 : i64, scratch_operands = 0 : i64, tpu.core_type = #tpu.core_type<tc>, window_params = [{pipeline_mode = #tpu.pipeline_mode<synchronous>, transform_indices = @transform_0, window_bounds = array<i64: 8, 40>}, {transform_indices = @transform_1, window_bounds = array<i64: 40, 128>}, {transform_indices = @transform_2, window_bounds = array<i64: 8, 128>}]} {
    %c0 = arith.constant 0 : index
    %c0_0 = arith.constant 0 : index
    %0 = vector.load %arg1[%c0, %c0_0] : memref<8x40xf32, #tpu.memory_space<vmem>>, vector<8x40xf32>
    %c0_1 = arith.constant 0 : index
    %c0_2 = arith.constant 0 : index
    %1 = vector.load %arg2[%c0_1, %c0_2] : memref<40x128xf32, #tpu.memory_space<vmem>>, vector<40x128xf32>
    %cst = arith.constant dense<0.000000e+00> : vector<8x128xf32>
    %2 = tpu.matmul %0, %1, %cst {dimension_numbers = #tpu.dot_dimension_numbers<[1], [0], [0], [1], [0, 0, 1, 1], [], []>} : vector<8x40xf32>, vector<40x128xf32>, vector<8x128xf32> -> vector<8x128xf32>
    %c0_3 = arith.constant 0 : index
    %c0_4 = arith.constant 0 : index
    %3 = vector.load %arg3[%c0_3, %c0_4] : memref<8x128xf32, #tpu.memory_space<vmem>>, vector<8x128xf32>
    tpu.vector_store %arg3[%c0_3, %c0_4], %2 {strides = array<i32>} : memref<8x128xf32, #tpu.memory_space<vmem>>, vector<8x128xf32>,
    return
  }
  func.func @transform_0(%arg0: i32) -> (i32, i32) {
    %c0_i32 = arith.constant 0 : i32
    %c0_i32_0 = arith.constant 0 : i32
    %c0_i32_1 = arith.constant 0 : i32
    return %c0_i32, %c0_i32_0 : i32, i32
  }
  func.func @transform_1(%arg0: i32) -> (i32, i32) {
    %c0_i32 = arith.constant 0 : i32
    %c0_i32_0 = arith.constant 0 : i32
    return %c0_i32, %arg0 : i32, i32
  }
  func.func @transform_2(%arg0: i32) -> (i32, i32) {
    %c0_i32 = arith.constant 0 : i32
    %c0_i32_0 = arith.constant 0 : i32
    return %c0_i32, %arg0 : i32, i32
  }
}

</mosaic_0001>

<bundles_post_ra>
// kernel: _lambda_.2
= control target key start
LH: loop header
LB: loop body
LE: loop exit
PB: predicated region body
PF: predicated region fallthrough
CT: control target
= control target key end

     0   :  { %v15_v1 = vlaneseq  ;;  %v213_v2 = vmov 0.0|0.0   ;;  %vm214_vm0 = vmmov 0   ;;  %v215_v4 = vmov 0.0   ;;  %s265_s0 = inlined_call_operand.vmem [shape: f32[36,72], index: 0, kind: input, shape index: {}]   ;;  %s266_s1 = inlined_call_operand.<no memory space> [shape: f32[], index: 1, kind: input, shape index: {}]   ;;  %s267_s2 = inlined_call_operand.vmem [shape: f32[8,36], index: 2, kind: input, shape index: {}]   ;;  %s268_s3 = inlined_call_operand.vmem [shape: f32[8,128], index: 3, kind: output, shape index: {}]  }
   0x1   :  { %v8_v0 = vstv %s266_s1  ;;  %204 = vmatprep.subr.bf16.mxu0 %v213_v2  ;;  %v22_v3 = vld [vmem:[%s265_s0] sm:$0xff]  ;;  %201 = vmatprep.mubr.msk.f32.mxu0 %vm214_vm0, %v215_v4  ;;  %v180_v6 = vld [vmem:[%s265_s0 + $0x8] sm:$0xff]  ;;  %v181_v7 = vld [vmem:[%s265_s0 + $0x10] sm:$0xff]  ;;  %vm101_vm4 = vcmask 326656  }
   0x2   :  { %v16_v5 = vand.u32 127, %v15_v1  ;;  %v182_v8 = vld [vmem:[%s265_s0 + $0x18] sm:$0xff]  ;;  %v83_v9 = vshrl.u32 %v15_v1, 7  ;;  %v183_v16 = vld [vmem:[%s265_s0 + $0x20] sm:$0xff] }
   0x3   :  { %v14_v19 = vld [vmem:[%s267_s2] sm:$0xff] }
   0x4   :  { %vm31_vm1 = vcmp.lt.s32.totalorder %v16_v5, 72  ;;  %v84_v10 = vadd.s32 32, %v83_v9  ;;  %vm18_vm3 = vcmp.lt.s32.totalorder %v16_v5, 36 }
   0x5   :  { %v32_v11 = vsel %vm31_vm1, %v22_v3, %v8_v0  ;;  %v46_v12 = vsel %vm31_vm1, %v180_v6, %v8_v0  ;;  %v61_v13 = vsel %vm31_vm1, %v181_v7, %v8_v0  ;;  %v76_v14 = vsel %vm31_vm1, %v182_v8, %v8_v0 }
   0x6   :  { %v205_v15 = vpack.c.bf16 %v46_v12, %v32_v11  ;;  %vm85_vm2 = vcmp.lt.s32.totalorder %v84_v10, 36  ;;  %v208_v17 = vpack.c.bf16 %v76_v14, %v61_v13  ;;  %v19_v21 = vsel %vm18_vm3, %v14_v19, %v8_v0 }
   0x7   :  { %v86_v18 = vsel %vm85_vm2, %v183_v16, %v8_v0 }
   0x8   :  { %206 = vmatpush3.bf16.msra.mxu0 %v205_v15  ;;  %v91_v20 = vsel %vm31_vm1, %v86_v18, %v8_v0 }
   0x9   :  { %207 = vmatprep.subr.bf16.mxu0 %v213_v2 }
   0xc   :  { %209 = vmatpush3.bf16.msra.mxu0 %v208_v17 }
   0xd   :  { %199 = vmatprep.subr.mxu0 %v215_v4 }
  0x10   :  { %200 = vmatpush3.msra.mxu0 %v91_v20 }
  0x11   :  { %202 = vmatmul.mubr.msk.f32.vlgmr.msra.gmra.mrb[0].mxu0 %vm101_vm4, %v19_v21 }
  0xe4   :  { %v171_v22 = vpop.f32.mrb[0].mxu0 }
  0xe5   :  { %175 = vst [vmem:[%s268_s3] sm:$0xff] %v171_v22  ;;  %v203_v23 = vpop.f32.mrb[1].mxu0 }

</bundles_post_ra>
